<compile_context>
chip_gen: v7x
topology: tpu7x:2x2x1
jax: 0.10.0
libtpu: 0.0.40
codegen_flags: <defaults>
</compile_context>

<pallas_src>
import functools

import jax
import jax.numpy as jnp
from jax.experimental import pallas as pl
from jax.experimental.pallas import tpu as pltpu

_NEG_BIG = -1e30  # finite "-inf" for padded vocab columns (avoids NaN from inf-inf)


def _round_up(x: int, m: int) -> int:
    return (x + m - 1) // m * m


def skipgram_kernel(x_ref, w_ref, b_ref, out_ref, m_sc, l_sc):
    """One (batch tile, vocab tile) grid step.

    x_ref   : (B_TILE, E_pad) bf16  gathered embeddings (cast/padded once in the wrapper)
    w_ref   : (E_pad, V_TILE) bf16  streamed linear-weight tile
    b_ref   : (1, V_TILE)     f32   streamed bias tile (padded lanes = -1e30)
    out_ref : (B_TILE, V_pad) f32   resident across the vocab (reduction) axis
    m_sc    : (B_TILE, 1)     f32   online-softmax running max
    l_sc    : (B_TILE, 1)     f32   online-softmax running exp-sum
    """
    j = pl.program_id(1)
    n_v = pl.num_programs(1)
    v_tile = w_ref.shape[1]

    @pl.when(j == 0)
    def _init():
        m_sc[...] = jnp.full_like(m_sc, -jnp.inf)
        l_sc[...] = jnp.zeros_like(l_sc)

    # MXU matmul in bf16 with f32 accumulation; bias add in f32.
    logits = jnp.dot(x_ref[...], w_ref[...], preferred_element_type=jnp.float32)
    logits = logits + b_ref[...]

    # Online (streaming) log-softmax statistics across the vocab axis.
    # Padded vocab columns carry bias = -1e30, so they never perturb max / exp-sum; the
    # first vocab tile always contains real columns (padding is tail-only), so m stays finite.
    m_prev = m_sc[...]
    m_new = jnp.maximum(m_prev, jnp.max(logits, axis=-1, keepdims=True))
    alpha = jnp.exp(m_prev - m_new)
    l_sc[...] = alpha * l_sc[...] + jnp.sum(jnp.exp(logits - m_new),
                                            axis=-1, keepdims=True)
    m_sc[...] = m_new

    # Raw logits go straight into the resident output block (no duplicate slab).
    col = pl.multiple_of(j * v_tile, v_tile)
    out_ref[:, pl.ds(col, v_tile)] = logits

    @pl.when(j == n_v - 1)
    def _finalize():
        lse = m_sc[...] + jnp.log(l_sc[...])   # (B_TILE, 1)
        out_ref[...] = out_ref[...] - lse      # single vectorized, lane-dense pass


@functools.partial(jax.jit, static_argnames=("b_tile", "v_tile"))
def skipgram_forward(inputs, emb_table, w, b, *, b_tile=256, v_tile=512):
    """inputs: (B,) int32; emb_table: (V, E) f32; w: (E, V) f32; b: (V,) f32 -> (B, V) log-probs."""
    V_emb, E = emb_table.shape
    V = w.shape[1]
    B = inputs.shape[0]

    E_pad = _round_up(max(E, 128), 128)              # lane/MXU-K aligned embedding dim
    V_pad = _round_up(max(V, v_tile), v_tile)
    n_v = V_pad // v_tile

    # --- Batch tiling policy ---------------------------------------------------------
    #  * big tiles (default 256) for MXU-M utilization and W reuse,
    #  * don't over-pad tiny batches,
    #  * cap so the double-buffered resident (b_tile, V_pad) f32 output block stays under
    #    ~24 MiB -> total VMEM well inside v7x's 64 MiB (and trivially v5e/v6e's 128 MiB),
    #  * keep >= 2 batch tiles when possible so the "parallel" axis feeds both TCs.
    b_tile = max(8, min(b_tile, _round_up(B, 8)))
    max_rows = max(8, ((24 * 1024 * 1024) // (V_pad * 4 * 2)) // 8 * 8)
    b_tile = min(b_tile, max_rows)
    if _round_up(B, b_tile) // b_tile < 2 and b_tile > 8:
        b_tile = max(8, _round_up(b_tile // 2, 8))
    B_pad = _round_up(B, b_tile)
    n_b = B_pad // b_tile

    # Embedding gather + padding + bf16 cast once in the wrapper (B*E is tiny), so the
    # kernel has no per-row DMA chain and no per-step cast on the critical path.
    ids = jnp.pad(inputs.astype(jnp.int32), (0, B_pad - B))            # padded rows -> token 0
    embeds = jnp.take(emb_table.astype(jnp.float32), ids, axis=0)      # (B_pad, E)
    embeds = jnp.pad(embeds, ((0, 0), (0, E_pad - E))).astype(jnp.bfloat16)
    w_p = jnp.pad(w.astype(jnp.float32),
                  ((0, E_pad - E), (0, V_pad - V))).astype(jnp.bfloat16)   # zero rows/cols
    b_p = jnp.pad(b.astype(jnp.float32), (0, V_pad - V),
                  constant_values=_NEG_BIG).reshape(1, V_pad)              # mask padded lanes

    # VMEM estimate (double-buffered inputs/outputs) -> scoped limit with headroom,
    # clamped to 64 MiB so it is valid on v7x as well as v5e/v6e.
    est = (2 * b_tile * E_pad * 2          # embeddings (bf16)
           + 2 * E_pad * v_tile * 2        # W tiles (bf16)
           + 2 * v_tile * 4                # bias tiles
           + 2 * b_tile * V_pad * 4        # resident output block
           + 4 * b_tile * 4)               # m/l scratch
    vmem_limit = int(min(64 * 1024 * 1024, max(32 * 1024 * 1024, est * 3 // 2)))

    out = pl.pallas_call(
        skipgram_kernel,
        out_shape=jax.ShapeDtypeStruct((B_pad, V_pad), jnp.float32),
        grid_spec=pltpu.PrefetchScalarGridSpec(
            num_scalar_prefetch=0,
            grid=(n_b, n_v),                                           # reduction (V) axis last
            in_specs=[
                pl.BlockSpec((b_tile, E_pad), lambda bi, j: (bi, 0)),  # embeddings (bf16)
                pl.BlockSpec((E_pad, v_tile), lambda bi, j: (0, j)),   # W tiles (bf16)
                pl.BlockSpec((1, v_tile), lambda bi, j: (0, j)),       # bias tiles (f32)
            ],
            out_specs=pl.BlockSpec((b_tile, V_pad), lambda bi, j: (bi, 0)),
            scratch_shapes=[
                pltpu.VMEM((b_tile, 1), jnp.float32),   # running max
                pltpu.VMEM((b_tile, 1), jnp.float32),   # running exp-sum
            ],
        ),
        compiler_params=pltpu.CompilerParams(
            dimension_semantics=("parallel", "arbitrary"),
            vmem_limit_bytes=vmem_limit,
        ),
    )(embeds, w_p, b_p)

    return out[:B, :V]


if __name__ == "__main__":
    # Small shapes consistent with the module, chosen to exercise multiple vocab tiles
    # (V_pad = 1536 -> 3 streamed 512-wide W tiles), E padding (64 -> 128), and >= 2 batch
    # tiles on the parallel axis (B = 12 -> two 8-row tiles).
    vocab_dim = 1280
    embed_dim = 64
    batch = 12

    key = jax.random.PRNGKey(0)
    k_emb, k_w, k_b, k_idx = jax.random.split(key, 4)

    # nn.Embedding default init: N(0, 1)
    emb_table = jax.random.normal(k_emb, (vocab_dim, embed_dim), dtype=jnp.float32)
    # nn.Linear default init: U(-1/sqrt(E), 1/sqrt(E)); weight stored transposed as (E, V)
    bound = 1.0 / (embed_dim ** 0.5)
    w = jax.random.uniform(k_w, (embed_dim, vocab_dim), dtype=jnp.float32,
                           minval=-bound, maxval=bound)
    b = jax.random.uniform(k_b, (vocab_dim,), dtype=jnp.float32,
                           minval=-bound, maxval=bound)

    inputs = jax.random.randint(k_idx, (batch,), 0, vocab_dim, dtype=jnp.int32)

    out = jax.block_until_ready(skipgram_forward(inputs, emb_table, w, b))

    # Plain-JAX f32 reference (bf16 MXU operands => loose-ish tolerance).
    ref = jax.nn.log_softmax(emb_table[inputs] @ w + b, axis=-1)
    assert out.shape == (batch, vocab_dim)
    max_err = float(jnp.max(jnp.abs(out - ref)))
    assert jnp.allclose(out, ref, atol=3e-2, rtol=3e-2), f"max abs err = {max_err}"

    print("KERNEL_OK")
</pallas_src>

<mosaic_0001>
module attributes {stable_mosaic.version = 11 : i64} {
  func.func @skipgram_kernel(%arg0: i32, %arg1: i32, %arg2: memref<8x128xbf16, #tpu.memory_space<vmem>>, %arg3: memref<128x512xbf16, #tpu.memory_space<vmem>>, %arg4: memref<1x512xf32, #tpu.memory_space<vmem>>, %arg5: memref<8x1536xf32, #tpu.memory_space<vmem>>, %arg6: memref<8x1xf32, #tpu.memory_space<vmem>>, %arg7: memref<8x1xf32, #tpu.memory_space<vmem>>) attributes {dimension_semantics = [#tpu.dimension_semantics<parallel>, #tpu.dimension_semantics<arbitrary>], iteration_bounds = array<i64: 2, 3>, scalar_prefetch = 0 : i64, scratch_operands = 2 : i64, tpu.core_type = #tpu.core_type<tc>, window_params = [{transform_indices = @transform_0, window_bounds = array<i64: 8, 128>}, {transform_indices = @transform_1, window_bounds = array<i64: 128, 512>}, {transform_indices = @transform_2, window_bounds = array<i64: 1, 512>}, {transform_indices = @transform_3, window_bounds = array<i64: 8, 1536>}]} {
    %c0_i32 = arith.constant 0 : i32
    %0 = arith.cmpi eq, %arg1, %c0_i32 : i32
    %1 = arith.extui %0 : i1 to i32
    %c0_i32_0 = arith.constant 0 : i32
    %2 = arith.cmpi ne, %1, %c0_i32_0 : i32
    scf.if %2 {
      %cst_18 = arith.constant 0xFF800000 : f32
      %32 = vector.broadcast %cst_18 : f32 to vector<8x1xf32>
      %c0_19 = arith.constant 0 : index
      %c0_20 = arith.constant 0 : index
      %33 = vector.load %arg6[%c0_19, %c0_20] : memref<8x1xf32, #tpu.memory_space<vmem>>, vector<8x1xf32>
      tpu.vector_store %arg6[%c0_19, %c0_20], %32 {strides = array<i32>} : memref<8x1xf32, #tpu.memory_space<vmem>>, vector<8x1xf32>,
      %cst_21 = arith.constant 0.000000e+00 : f32
      %34 = vector.broadcast %cst_21 : f32 to vector<8x1xf32>
      %c0_22 = arith.constant 0 : index
      %c0_23 = arith.constant 0 : index
      %35 = vector.load %arg7[%c0_22, %c0_23] : memref<8x1xf32, #tpu.memory_space<vmem>>, vector<8x1xf32>
      tpu.vector_store %arg7[%c0_22, %c0_23], %34 {strides = array<i32>} : memref<8x1xf32, #tpu.memory_space<vmem>>, vector<8x1xf32>,
    } else {
    }
    %c0 = arith.constant 0 : index
    %c0_1 = arith.constant 0 : index
    %3 = vector.load %arg2[%c0, %c0_1] : memref<8x128xbf16, #tpu.memory_space<vmem>>, vector<8x128xbf16>
    %c0_2 = arith.constant 0 : index
    %c0_3 = arith.constant 0 : index
    %4 = vector.load %arg3[%c0_2, %c0_3] : memref<128x512xbf16, #tpu.memory_space<vmem>>, vector<128x512xbf16>
    %cst = arith.constant dense<0.000000e+00> : vector<8x512xf32>
    %5 = tpu.matmul %3, %4, %cst {dimension_numbers = #tpu.dot_dimension_numbers<[1], [0], [0], [1], [0, 0, 1, 1], [], []>} : vector<8x128xbf16>, vector<128x512xbf16>, vector<8x512xf32> -> vector<8x512xf32>
    %c0_4 = arith.constant 0 : index
    %c0_5 = arith.constant 0 : index
    %6 = vector.load %arg4[%c0_4, %c0_5] : memref<1x512xf32, #tpu.memory_space<vmem>>, vector<1x512xf32>
    %7 = vector.broadcast %6 : vector<1x512xf32> to vector<8x512xf32>
    %8 = arith.addf %5, %7 : vector<8x512xf32>
    %c0_6 = arith.constant 0 : index
    %c0_7 = arith.constant 0 : index
    %9 = vector.load %arg6[%c0_6, %c0_7] : memref<8x1xf32, #tpu.memory_space<vmem>>, vector<8x1xf32>
    %cst_8 = arith.constant dense<0xFF800000> : vector<8xf32>
    %10 = vector.multi_reduction <maximumf>, %8, %cst_8 [1] : vector<8x512xf32> to vector<8xf32>
    %11 = vector.shape_cast %10 : vector<8xf32> to vector<8x1xf32>
    %12 = arith.maximumf %9, %11 : vector<8x1xf32>
    %13 = arith.subf %9, %12 : vector<8x1xf32>
    %14 = math.exp %13 : vector<8x1xf32>
    %c0_9 = arith.constant 0 : index
    %c0_10 = arith.constant 0 : index
    %15 = vector.load %arg7[%c0_9, %c0_10] : memref<8x1xf32, #tpu.memory_space<vmem>>, vector<8x1xf32>
    %16 = arith.mulf %14, %15 : vector<8x1xf32>
    %17 = vector.broadcast %12 : vector<8x1xf32> to vector<8x512xf32>
    %18 = arith.subf %8, %17 : vector<8x512xf32>
    %19 = math.exp %18 : vector<8x512xf32>
    %cst_11 = arith.constant dense<0.000000e+00> : vector<8xf32>
    %20 = vector.multi_reduction <add>, %19, %cst_11 [1] : vector<8x512xf32> to vector<8xf32>
    %21 = vector.shape_cast %20 : vector<8xf32> to vector<8x1xf32>
    %22 = arith.addf %16, %21 : vector<8x1xf32>
    %c0_12 = arith.constant 0 : index
    %c0_13 = arith.constant 0 : index
    %23 = vector.load %arg7[%c0_12, %c0_13] : memref<8x1xf32, #tpu.memory_space<vmem>>, vector<8x1xf32>
    tpu.vector_store %arg7[%c0_12, %c0_13], %22 {strides = array<i32>} : memref<8x1xf32, #tpu.memory_space<vmem>>, vector<8x1xf32>,
    %c0_14 = arith.constant 0 : index
    %c0_15 = arith.constant 0 : index
    %24 = vector.load %arg6[%c0_14, %c0_15] : memref<8x1xf32, #tpu.memory_space<vmem>>, vector<8x1xf32>
    tpu.vector_store %arg6[%c0_14, %c0_15], %12 {strides = array<i32>} : memref<8x1xf32, #tpu.memory_space<vmem>>, vector<8x1xf32>,
    %c512_i32 = arith.constant 512 : i32
    %25 = arith.muli %arg1, %c512_i32 : i32
    %26 = tpu.assume_multiple %25, 512 : i32
    %c0_16 = arith.constant 0 : index
    %27 = arith.index_cast %26 : i32 to index
    %28 = vector.load %arg5[%c0_16, %27] : memref<8x1536xf32, #tpu.memory_space<vmem>>, vector<8x512xf32>
    tpu.vector_store %arg5[%c0_16, %27], %8 {strides = array<i32>} : memref<8x1536xf32, #tpu.memory_space<vmem>>, vector<8x512xf32>,
    %c2_i32 = arith.constant 2 : i32
    %29 = arith.cmpi eq, %arg1, %c2_i32 : i32
    %30 = arith.extui %29 : i1 to i32
    %c0_i32_17 = arith.constant 0 : i32
    %31 = arith.cmpi ne, %30, %c0_i32_17 : i32
    scf.if %31 {
      %c0_18 = arith.constant 0 : index
      %c0_19 = arith.constant 0 : index
      %32 = vector.load %arg6[%c0_18, %c0_19] : memref<8x1xf32, #tpu.memory_space<vmem>>, vector<8x1xf32>
      %c0_20 = arith.constant 0 : index
      %c0_21 = arith.constant 0 : index
      %33 = vector.load %arg7[%c0_20, %c0_21] : memref<8x1xf32, #tpu.memory_space<vmem>>, vector<8x1xf32>
      %34 = math.log %33 : vector<8x1xf32>
      %35 = arith.addf %32, %34 : vector<8x1xf32>
      %c0_22 = arith.constant 0 : index
      %c0_23 = arith.constant 0 : index
      %36 = vector.load %arg5[%c0_22, %c0_23] : memref<8x1536xf32, #tpu.memory_space<vmem>>, vector<8x1536xf32>
      %37 = vector.broadcast %35 : vector<8x1xf32> to vector<8x1536xf32>
      %38 = arith.subf %36, %37 : vector<8x1536xf32>
      %c0_24 = arith.constant 0 : index
      %c0_25 = arith.constant 0 : index
      %39 = vector.load %arg5[%c0_24, %c0_25] : memref<8x1536xf32, #tpu.memory_space<vmem>>, vector<8x1536xf32>
      tpu.vector_store %arg5[%c0_24, %c0_25], %38 {strides = array<i32>} : memref<8x1536xf32, #tpu.memory_space<vmem>>, vector<8x1536xf32>,
    } else {
    }
    return
  }
  func.func @transform_0(%arg0: i32, %arg1: i32) -> (i32, i32) {
    %c0_i32 = arith.constant 0 : i32
    %c0_i32_0 = arith.constant 0 : i32
    return %arg0, %c0_i32 : i32, i32
  }
  func.func @transform_1(%arg0: i32, %arg1: i32) -> (i32, i32) {
    %c0_i32 = arith.constant 0 : i32
    %c0_i32_0 = arith.constant 0 : i32
    return %c0_i32, %arg1 : i32, i32
  }
  func.func @transform_2(%arg0: i32, %arg1: i32) -> (i32, i32) {
    %c0_i32 = arith.constant 0 : i32
    %c0_i32_0 = arith.constant 0 : i32
    return %c0_i32, %arg1 : i32, i32
  }
  func.func @transform_3(%arg0: i32, %arg1: i32) -> (i32, i32) {
    %c0_i32 = arith.constant 0 : i32
    %c0_i32_0 = arith.constant 0 : i32
    return %arg0, %c0_i32 : i32, i32
  }
}

</mosaic_0001>

<bundles_post_ra>
// kernel: skipgram_forward.1
= control target key start
LH: loop header
LB: loop body
LE: loop exit
PB: predicated region body
PF: predicated region fallthrough
CT: control target
= control target key end

     0   :  { %s1053_s12 = smov 0   ;;  %s1055_s13 = smov 0   ;;  %s1291_s0 = inlined_call_operand.vmem [shape: bf16[16,128], index: 0, kind: input, shape index: {}]   ;;  %s1292_s1 = inlined_call_operand.vmem [shape: bf16[128,1536], index: 1, kind: input, shape index: {}]   ;;  %s1293_s2 = inlined_call_operand.vmem [shape: f32[1,1536], index: 2, kind: input, shape index: {}]   ;;  %s1294_s3 = inlined_call_operand.vmem [shape: f32[16,1536], index: 3, kind: output, shape index: {}]  }
   0x1   :  { %s1057_s14 = smov 0   ;;  %s1059_s15 = smov 0  }
   0x2   :  { %s1061_s16 = smov 0   ;;  %s1063_s17 = smov 0  }
   0x3   :  { %s1065_s18 = smov 0  }
   0x4 LB: > { %s22_s19 = sadd.s32 1, %s1019_s16  ;;  %s25_s20 = sadd.s32 1, %s1023_s17  ;;  %s1027_s18 = sphi %s1065_s18, %s13_s18   ;;  %s1023_s17 = sphi %s1063_s17, %s1300_s17   ;;  %s1019_s16 = sphi %s1061_s16, %s1299_s16   ;;  %s1015_s15 = sphi %s1059_s15, %s1298_s15   ;;  %s1011_s14 = sphi %s1057_s14, %s1297_s14   ;;  %s1007_s13 = sphi %s1055_s13, %s1296_s13   ;;  %s1003_s12 = sphi %s1053_s12, %s1295_s12  }
   0x5   : > { %p23_p0 = scmp.ge.s32.totalorder %s22_s19, 3  ;;  %s58_s21 = sadd.s32 1, %s1007_s13 }
   0x6   : > { %p65_p1 = scmp.ne.s32.totalorder %s1007_s13, %s1003_s12  ;;  %p66_p2 = scmp.eq.s32.totalorder %s1027_s18, 0 }
   0x7   : > { %s1302_s19 = smov (%p23_p0, %s22_s19), 0  ;;  %s1304_s20 = smov (!%p23_p0, %s25_s20), %s1023_s17 }
   0x8   : > { %s55_s22 = ssub.s32 %s1019_s16, %s1302_s19  ;;  %p67_p3 = por %p66_p2, %p65_p1 }
   0x9   : > { %p27_p4 = scmp.ge.s32.totalorder %s1304_s20, 2  ;;  %p56_p5 = scmp.eq.s32.totalorder %s55_s22, 0 }
   0xa   : > { %p802_p6 = scmp.ge.s32.totalorder %s1027_s18, 6 }
   0xb   : > { %s1306_s20 = smov (%p27_p4, %s1304_s20), 0 }
   0xc   : > { %s1102_s23 = scalar_select %p56_p5, %s1007_s13, %s58_s21  }
   0xd   : > { %143 = sbr.rel (%p802_p6) target bundleno = 40 (0x28), region = 16 }
  0x14   : > { %153 = sbr.rel (!%p67_p3) target bundleno = 40 (0x28), region = 24  ;;  %s155_s24 = sand.u32 (%p67_p3), 1, %s1007_s13  }
  0x15   : > { %s849_s25 = sshll.u32 (%p67_p3), %s1019_s16, 4  ;;  %s803_s26 = sshll.u32 (%p67_p3), %s155_s24, 8 }
  0x16   : > { %s1110_s29 = scalar_lea.vmem (%p67_p3), %s1292_s1, %s849_s25  ;;  %s1115_s30 = scalar_lea.vmem (%p67_p3), [#allocation4], %s803_s26 }
  0x17   : > { %v173_v0 = vld [vmem:[%s1110_s29] sm:$0xff] (%p67_p3)  ;;  %v175_v1 = vld [vmem:[%s1110_s29 + $0x8] sm:$0xff] (%p67_p3)  ;;  %v177_v2 = vld [vmem:[%s1110_s29 + $0x30] sm:$0xff] (%p67_p3) }
  0x18   : > { %174 = vst [vmem:[%s1115_s30] sm:$0xff] (%p67_p3), %v173_v0  ;;  %176 = vst [vmem:[%s1115_s30 + $0x8] sm:$0xff] (%p67_p3), %v175_v1  ;;  %v179_v3 = vld [vmem:[%s1110_s29 + $0x38] sm:$0xff] (%p67_p3)  ;;  %v181_v4 = vld [vmem:[%s1110_s29 + $0x60] sm:$0xff] (%p67_p3) }
  0x19   : > { %178 = vst [vmem:[%s1115_s30 + $0x10] sm:$0xff] (%p67_p3), %v177_v2  ;;  %v183_v5 = vld [vmem:[%s1110_s29 + $0x68] sm:$0xff] (%p67_p3)  ;;  %180 = vst [vmem:[%s1115_s30 + $0x18] sm:$0xff] (%p67_p3), %v179_v3  ;;  %v185_v6 = vld [vmem:[%s1110_s29 + $0x90] sm:$0xff] (%p67_p3) }
  0x1a   : > { %182 = vst [vmem:[%s1115_s30 + $0x20] sm:$0xff] (%p67_p3), %v181_v4  ;;  %184 = vst [vmem:[%s1115_s30 + $0x28] sm:$0xff] (%p67_p3), %v183_v5  ;;  %v187_v7 = vld [vmem:[%s1110_s29 + $0x98] sm:$0xff] (%p67_p3)  ;;  %v189_v8 = vld [vmem:[%s1110_s29 + $0xc0] sm:$0xff] (%p67_p3) }
  0x1b   : > { %186 = vst [vmem:[%s1115_s30 + $0x30] sm:$0xff] %v185_v6  ;;  %188 = vst [vmem:[%s1115_s30 + $0x38] sm:$0xff] %v187_v7  ;;  %v191_v9 = vld [vmem:[%s1110_s29 + $0xc8] sm:$0xff]  ;;  %v193_v10 = vld [vmem:[%s1110_s29 + $0xf0] sm:$0xff] }
  0x1c   : > { %190 = vst [vmem:[%s1115_s30 + $0x40] sm:$0xff] %v189_v8  ;;  %v195_v11 = vld [vmem:[%s1110_s29 + $0xf8] sm:$0xff]  ;;  %192 = vst [vmem:[%s1115_s30 + $0x48] sm:$0xff] %v191_v9  ;;  %v197_v12 = vld [vmem:[%s1110_s29 + $0x120] sm:$0xff] }
  0x1d   : > { %194 = vst [vmem:[%s1115_s30 + $0x50] sm:$0xff] %v193_v10  ;;  %196 = vst [vmem:[%s1115_s30 + $0x58] sm:$0xff] %v195_v11  ;;  %v199_v13 = vld [vmem:[%s1110_s29 + $0x128] sm:$0xff]  ;;  %v201_v14 = vld [vmem:[%s1110_s29 + $0x150] sm:$0xff] }
  0x1e   : > { %198 = vst [vmem:[%s1115_s30 + $0x60] sm:$0xff] %v197_v12  ;;  %200 = vst [vmem:[%s1115_s30 + $0x68] sm:$0xff] %v199_v13  ;;  %v203_v15 = vld [vmem:[%s1110_s29 + $0x158] sm:$0xff]  ;;  %v205_v16 = vld [vmem:[%s1110_s29 + $0x180] sm:$0xff] }
  0x1f   : > { %202 = vst [vmem:[%s1115_s30 + $0x70] sm:$0xff] %v201_v14  ;;  %v207_v17 = vld [vmem:[%s1110_s29 + $0x188] sm:$0xff]  ;;  %204 = vst [vmem:[%s1115_s30 + $0x78] sm:$0xff] %v203_v15  ;;  %v209_v18 = vld [vmem:[%s1110_s29 + $0x1b0] sm:$0xff] }
  0x20   : > { %206 = vst [vmem:[%s1115_s30 + $0x80] sm:$0xff] %v205_v16  ;;  %208 = vst [vmem:[%s1115_s30 + $0x88] sm:$0xff] %v207_v17  ;;  %v211_v19 = vld [vmem:[%s1110_s29 + $0x1b8] sm:$0xff]  ;;  %v213_v20 = vld [vmem:[%s1110_s29 + $0x1e0] sm:$0xff] }
  0x21   : > { %210 = vst [vmem:[%s1115_s30 + $0x90] sm:$0xff] %v209_v18  ;;  %212 = vst [vmem:[%s1115_s30 + $0x98] sm:$0xff] %v211_v19  ;;  %v215_v21 = vld [vmem:[%s1110_s29 + $0x1e8] sm:$0xff]  ;;  %v217_v22 = vld [vmem:[%s1110_s29 + $0x210] sm:$0xff] }
  0x22   : > { %214 = vst [vmem:[%s1115_s30 + $0xa0] sm:$0xff] %v213_v20  ;;  %v219_v23 = vld [vmem:[%s1110_s29 + $0x218] sm:$0xff]  ;;  %216 = vst [vmem:[%s1115_s30 + $0xa8] sm:$0xff] %v215_v21  ;;  %v221_v24 = vld [vmem:[%s1110_s29 + $0x240] sm:$0xff] }
  0x23   : > { %218 = vst [vmem:[%s1115_s30 + $0xb0] sm:$0xff] %v217_v22  ;;  %220 = vst [vmem:[%s1115_s30 + $0xb8] sm:$0xff] %v219_v23  ;;  %v223_v25 = vld [vmem:[%s1110_s29 + $0x248] sm:$0xff]  ;;  %v225_v26 = vld [vmem:[%s1110_s29 + $0x270] sm:$0xff] }
  0x24   : > { %222 = vst [vmem:[%s1115_s30 + $0xc0] sm:$0xff] %v221_v24  ;;  %224 = vst [vmem:[%s1115_s30 + $0xc8] sm:$0xff] %v223_v25  ;;  %v227_v27 = vld [vmem:[%s1110_s29 + $0x278] sm:$0xff]  ;;  %v229_v28 = vld [vmem:[%s1110_s29 + $0x2a0] sm:$0xff] }
  0x25   : > { %226 = vst [vmem:[%s1115_s30 + $0xd0] sm:$0xff] %v225_v26  ;;  %v231_v29 = vld [vmem:[%s1110_s29 + $0x2a8] sm:$0xff]  ;;  %228 = vst [vmem:[%s1115_s30 + $0xd8] sm:$0xff] %v227_v27  ;;  %v233_v30 = vld [vmem:[%s1110_s29 + $0x2d0] sm:$0xff] }
  0x26   : > { %230 = vst [vmem:[%s1115_s30 + $0xe0] sm:$0xff] %v229_v28  ;;  %232 = vst [vmem:[%s1115_s30 + $0xe8] sm:$0xff] %v231_v29  ;;  %v235_v31 = vld [vmem:[%s1110_s29 + $0x2d8] sm:$0xff] }
  0x27   : > { %234 = vst [vmem:[%s1115_s30 + $0xf0] sm:$0xff] %v233_v30  ;;  %236 = vst [vmem:[%s1115_s30 + $0xf8] sm:$0xff] %v235_v31 }
  0x28 PF: > { %p806_p7 = scmp.ge.s32.totalorder %s1027_s18, 1  ;;  %p249_p8 = scmp.lt.s32.totalorder %s1027_s18, 7 }
  0x2a   : > { %p250_p9 = pnand %p806_p7, %p249_p8 }
  0x2b   : > { %s256_s4 = sand.u32 (!%p250_p9), 1, %s1003_s12   ;;  %p287_p10 = scmp.lt.s32.totalorder (!%p250_p9), %s1015_s15, 1 }
  0x2c   : > { %253 = sbr.rel (%p250_p9) target bundleno = 913 (0x391), region = 51  ;;  %s807_s5 = sshll.u32 (!%p250_p9), %s256_s4, 8 }
  0x2d   : > { %s809_s6 = sshll.u32 (!%p250_p9), %s1011_s14, 2  ;;  %s1200_s27 = scalar_lea.vmem (!%p250_p9), [#allocation4], %s807_s5 }
  0x2e   : > { %p293_p11 = scmp.lt.s32.totalorder (!%p250_p9), %s809_s6, 11  ;;  %p811_p12 = scmp.ne.s32.totalorder (!%p250_p9), %s1011_s14, 0 }
  0x33   : > { %s1308_s15 = smov (!%p287_p10, %s1015_s15), 1  ;;  %s1310_s6 = smov (!%p293_p11, %s809_s6), 11 }
  0x34   : > { %s808_s7 = sshll.u32 %s1308_s15, 2  ;;  %s850_s8 = smul.u32 96, %s1308_s15  ;;  %vm307_vm0 = vcmask (!%p811_p12), 7168   ;;  %v1029_v32 = vmov (!%p811_p12), -inf   ;;  %v1030_v33 = vmov (!%p811_p12), 0.0  }
  0x35   : > { %s1189_s11 = scalar_lea.vmem %s1291_s0, %s808_s7  ;;  %s295_s24 = scalar_lea.vmem %s1293_s2, %s1310_s6  ;;  %308 = vst.msk [vmem:[#allocation2] sm:$0xff] (!%p811_p12), %vm307_vm0, %v1029_v32  ;;  %309 = vst.msk [vmem:[#allocation3] sm:$0xff] (!%p811_p12), %vm307_vm0, %v1030_v33 }
  0x36   : > { %s1198_s26 = scalar_lea.vmem %s1294_s3, %s850_s8  ;;  %306 = sbr.rel (%p811_p12) target bundleno = 61 (0x3d), region = 59 }
  0x3d PF: > { %v912_v34 = vld [vmem:[%s1200_s27 + $0x4] ss:$16 sps:$4 sm:$0xff]   ;;  %v914_v35 = vld [vmem:[%s1200_s27 + $0xc] ss:$16 sps:$4 sm:$0xff]   ;;  %v1031_v36 = vmov 0   ;;  %v345_v4 = vlaneseq  ;;  %s844_s15 = sshll.u32 %s1011_s14, 9 }
  0x3e   : > { %557 = vmatprep.mubr.bf16.mxu0 %v1031_v36  ;;  %598 = vmatprep.mubr.bf16.mxu1 %v1031_v36  ;;  %v916_v37 = vld [vmem:[%s1200_s27] ss:$16 sps:$4 sm:$0xff]   ;;  %v917_v38 = vld [vmem:[%s1200_s27 + $0x8] ss:$16 sps:$4 sm:$0xff]   ;;  %v918_v39 = vld [vmem:[%s1200_s27 + $0x24] ss:$16 sps:$4 sm:$0xff]  }
  0x3f   : > { %525 = vmatprep.subr.bf16.mxu0 %v912_v34  ;;  %911 = vset.pattern.permute.xlu0 %v1031_v36  ;;  %v920_v40 = vld [vmem:[%s1200_s27 + $0x2c] ss:$16 sps:$4 sm:$0xff]   ;;  %v922_v41 = vld [vmem:[%s1200_s27 + $0x20] ss:$16 sps:$4 sm:$0xff]   ;;  %v923_v42 = vld [vmem:[%s1200_s27 + $0x28] ss:$16 sps:$4 sm:$0xff]  }
  0x40   : > { %566 = vmatprep.subr.bf16.mxu1 %v914_v35  ;;  %526 = vmatpush1.bf16.msra.mxu0 %v916_v37  ;;  %v924_v43 = vld [vmem:[%s1200_s27 + $0x44] ss:$16 sps:$4 sm:$0xff]   ;;  %v926_v44 = vld [vmem:[%s1200_s27 + $0x4c] ss:$16 sps:$4 sm:$0xff]   ;;  %v928_v45 = vld [vmem:[%s1200_s27 + $0x40] ss:$16 sps:$4 sm:$0xff]  }
  0x41   : > { %567 = vmatpush1.bf16.msra.mxu1 %v917_v38  ;;  %527 = vmatprep.subr.bf16.mxu0 %v918_v39  ;;  %v929_v46 = vld [vmem:[%s1200_s27 + $0x48] ss:$16 sps:$4 sm:$0xff]   ;;  %v930_v47 = vld [vmem:[%s1200_s27 + $0x64] ss:$16 sps:$4 sm:$0xff]   ;;  %v932_v48 = vld [vmem:[%s1200_s27 + $0x6c] ss:$16 sps:$4 sm:$0xff]  }
  0x42   : > { %568 = vmatprep.subr.bf16.mxu1 %v920_v40  ;;  %v934_v49 = vld [vmem:[%s1200_s27 + $0x60] ss:$16 sps:$4 sm:$0xff]   ;;  %v935_v50 = vld [vmem:[%s1200_s27 + $0x68] ss:$16 sps:$4 sm:$0xff]   ;;  %v936_v51 = vld [vmem:[%s1200_s27 + $0x84] ss:$16 sps:$4 sm:$0xff]  }
  0x43   : > { %v938_v52 = vld [vmem:[%s1200_s27 + $0x8c] ss:$16 sps:$4 sm:$0xff]   ;;  %v940_v53 = vld [vmem:[%s1200_s27 + $0x80] ss:$16 sps:$4 sm:$0xff]   ;;  %v941_v54 = vld [vmem:[%s1200_s27 + $0x88] ss:$16 sps:$4 sm:$0xff]  }
  0x44   : > { %528 = vmatpush1.bf16.msra.mxu0 %v922_v41  ;;  %v942_v55 = vld [vmem:[%s1200_s27 + $0xa4] ss:$16 sps:$4 sm:$0xff]   ;;  %v944_v56 = vld [vmem:[%s1200_s27 + $0xac] ss:$16 sps:$4 sm:$0xff]   ;;  %v946_v57 = vld [vmem:[%s1200_s27 + $0xa0] ss:$16 sps:$4 sm:$0xff]  }
  0x45   : > { %569 = vmatpush1.bf16.msra.mxu1 %v923_v42  ;;  %529 = vmatprep.subr.bf16.mxu0 %v924_v43  ;;  %v947_v58 = vld [vmem:[%s1200_s27 + $0xa8] ss:$16 sps:$4 sm:$0xff]   ;;  %v948_v59 = vld [vmem:[%s1200_s27 + $0xc4] ss:$16 sps:$4 sm:$0xff]   ;;  %v950_v60 = vld [vmem:[%s1200_s27 + $0xcc] ss:$16 sps:$4 sm:$0xff]  }
  0x46   : > { %570 = vmatprep.subr.bf16.mxu1 %v926_v44  ;;  %v952_v61 = vld [vmem:[%s1200_s27 + $0xc0] ss:$16 sps:$4 sm:$0xff]   ;;  %v953_v62 = vld [vmem:[%s1200_s27 + $0xc8] ss:$16 sps:$4 sm:$0xff]   ;;  %v954_v63 = vld [vmem:[%s1200_s27 + $0xe4] ss:$16 sps:$4 sm:$0xff]  }
  0x47   : > { %v956_v0 = vld [vmem:[%s1200_s27 + $0xec] ss:$16 sps:$4 sm:$0xff]   ;;  %v958_v1 = vld [vmem:[%s1200_s27 + $0xe0] ss:$16 sps:$4 sm:$0xff]   ;;  %v959_v2 = vld [vmem:[%s1200_s27 + $0xe8] ss:$16 sps:$4 sm:$0xff]  }
  0x48   : > { %530 = vmatpush1.bf16.msra.mxu0 %v928_v45  ;;  %v310_v3 = vld [vmem:[%s1189_s11] sm:$0xf]  ;;  %v346_v5 = vshrl.u32 %v345_v4, 7  ;;  %s646_s30 = sshra.s32 %s844_s15, 7  ;;  %vm642_vm1 = vcmask 7168   ;;  %p846_p13 = scmp.ne.s32.totalorder %s1011_s14, 2 }
  0x49   : > { %571 = vmatpush1.bf16.msra.mxu1 %v929_v46  ;;  %531 = vmatprep.subr.bf16.mxu0 %v930_v47  ;;  %v343_v8 = vld [vmem:[%s295_s24] sm:$0xf]  ;;  %s845_s4 = sshll.u32 %s646_s30, 3 }
  0x4a   : > { %572 = vmatprep.subr.bf16.mxu1 %v932_v48  ;;  %v347_v6 = vsub.s32 0, %v346_v5  ;;  %v355_v7 = vsub.s32 2, %v346_v5  ;;  %v351_v9 = vsub.s32 1, %v346_v5  ;;  %v359_v10 = vsub.s32 3, %v346_v5  ;;  %s649_s5 = scalar_lea.vmem %s1198_s26, %s845_s4  ;;  %v607_v30 = vld [vmem:[#allocation2] sm:$0xff] }
  0x4c   : > { %532 = vmatpush1.bf16.msra.mxu0 %v934_v49  ;;  %v348_v11 = vrot.slane %v343_v8, %v347_v6  ;;  %v356_v12 = vrot.slane %v343_v8, %v355_v7  ;;  %v352_v13 = vrot.slane %v343_v8, %v351_v9  ;;  %v360_v14 = vrot.slane %v343_v8, %v359_v10 }
  0x4d   : > { %573 = vmatpush1.bf16.msra.mxu1 %v935_v50  ;;  %533 = vmatprep.subr.bf16.mxu0 %v936_v51 }
  0x4e   : > { %574 = vmatprep.subr.bf16.mxu1 %v938_v52  ;;  %v617_v52 = vld [vmem:[#allocation3] sm:$0xff] }
  0x50   : > { %534 = vmatpush1.bf16.msra.mxu0 %v940_v53 }
  0x51   : > { %575 = vmatpush1.bf16.msra.mxu1 %v941_v54  ;;  %535 = vmatprep.subr.bf16.mxu0 %v942_v55 }
  0x52   : > { %576 = vmatprep.subr.bf16.mxu1 %v944_v56 }
  0x54   : > { %536 = vmatpush1.bf16.msra.mxu0 %v946_v57  ;;  %v1032_v57 = vmov (!%p846_p13), 0  }
  0x55   : > { %577 = vmatpush1.bf16.msra.mxu1 %v947_v58  ;;  %537 = vmatprep.subr.bf16.mxu0 %v948_v59 }
  0x56   : > { %578 = vmatprep.subr.bf16.mxu1 %v950_v60 }
  0x58   : > { %538 = vmatpush1.bf16.msra.mxu0 %v952_v61 }
  0x59   : > { %579 = vmatpush1.bf16.msra.mxu1 %v953_v62  ;;  %539 = vmatprep.subr.bf16.mxu0 %v954_v63 }
  0x5a   : > { %580 = vmatprep.subr.bf16.mxu1 %v956_v0 }
  0x5c   : > { %540 = vmatpush1.bf16.msra.mxu0 %v958_v1 }
  0x5d   : > { %581 = vmatpush1.bf16.msra.mxu1 %v959_v2 }
  0x5f   : > { %558 = vmatmul.mubr.bf16.vlgmr.msra.gmra.mrb[0].mxu0 %v310_v3 }
  0x60   : > { %599 = vmatmul.mubr.bf16.vlgmr.msra.gmra.mrb[0].mxu1 %v310_v3 }
 0x132   : > { %v559_v15 = vpop.f32.mrb[0].mxu0 }
 0x133   : > { %v600_v16 = vpop.f32.mrb[0].mxu1  ;;  %v560_v17 = vadd.f32 %v559_v15, %v348_v11  ;;  %v561_v19 = vpop.f32.mrb[1].mxu0 }
 0x134   : > { %v601_v18 = vadd.f32 %v600_v16, %v356_v12  ;;  %v602_v20 = vpop.f32.mrb[1].mxu1  ;;  %v562_v21 = vadd.f32 %v561_v19, %v352_v13  ;;  %v563_v23 = vpop.f32.mrb[2].mxu0 }
 0x135   : > { %v603_v22 = vadd.f32 %v602_v20, %v360_v14  ;;  %v604_v24 = vpop.f32.mrb[2].mxu1  ;;  %650 = vst [vmem:[%s649_s5] sm:$0xff] %v560_v17  ;;  %v564_v25 = vpop.f32.mrb[3].mxu0 }
 0x136   : > { %652 = vst [vmem:[%s649_s5 + $0x10] sm:$0xff] %v601_v18  ;;  %v605_v26 = vpop.f32.mrb[3].mxu1  ;;  %651 = vst [vmem:[%s649_s5 + $0x8] sm:$0xff] %v562_v21  ;;  %v608_v27 = vmax.f32 %v560_v17, %v562_v21 }
 0x137   : > { %653 = vst [vmem:[%s649_s5 + $0x18] sm:$0xff] %v603_v22  ;;  %v609_v28 = vmax.f32 %v601_v18, %v603_v22 }
 0x139   : > { %v610_v29 = vmax.f32 %v608_v27, %v609_v28 }
 0x13b   : > { %611 = vmax.xlane.f32.xlu0 %v610_v29 }
 0x13e   : > { %v663_v62 = vld [vmem:[%s1198_s26] sm:$0xff] (!%p846_p13)  ;;  %v664_v63 = vld [vmem:[%s1198_s26 + $0x8] sm:$0xff] (!%p846_p13)  ;;  %v665_v0 = vld [vmem:[%s1198_s26 + $0x10] sm:$0xff] (!%p846_p13) }
 0x13f   : > { %v666_v1 = vld [vmem:[%s1198_s26 + $0x18] sm:$0xff] (!%p846_p13)  ;;  %v667_v2 = vld [vmem:[%s1198_s26 + $0x20] sm:$0xff] (!%p846_p13)  ;;  %v668_v3 = vld [vmem:[%s1198_s26 + $0x28] sm:$0xff] (!%p846_p13) }
 0x140   : > { %v669_v4 = vld [vmem:[%s1198_s26 + $0x30] sm:$0xff] (!%p846_p13)  ;;  %v670_v5 = vld [vmem:[%s1198_s26 + $0x38] sm:$0xff] (!%p846_p13)  ;;  %v671_v6 = vld [vmem:[%s1198_s26 + $0x40] sm:$0xff] (!%p846_p13) }
 0x141   : > { %v672_v7 = vld [vmem:[%s1198_s26 + $0x48] sm:$0xff] (!%p846_p13)  ;;  %v673_v8 = vld [vmem:[%s1198_s26 + $0x50] sm:$0xff] (!%p846_p13)  ;;  %v674_v9 = vld [vmem:[%s1198_s26 + $0x58] sm:$0xff] (!%p846_p13) }
 0x1c8   : > { %v612_v31 = vpop.xlane.xlu0 %611 }
 0x1c9   : > { %v613_v32 = vmax.f32 %v607_v30, %v612_v31 }
 0x1cb   : > { %v614_v33 = vsub.f32 %v607_v30, %v613_v32  ;;  %644 = vst.msk [vmem:[#allocation2] sm:$0xff] %vm642_vm1, %v613_v32  ;;  %621 = vperm.xlu0 %911, %v613_v32  }
 0x1cd   : > { %v615_v50 = vmul.f32 1.442695, %v614_v33 }
 0x1cf   : > { %970 = vset.pattern.permute.xlu0 (!%p846_p13), %v1032_v57 }
 0x1d2   : > { %v658_v59 = vld [vmem:[#allocation2] sm:$0xff] (!%p846_p13) }
 0x24a   : > { %v622_v34 = vpop.permute.xlu0 %621 }
 0x24b   : > { %v624_v35 = vsub.f32 %v560_v17, %v622_v34  ;;  %v625_v36 = vsub.f32 %v562_v21, %v622_v34  ;;  %v626_v37 = vsub.f32 %v601_v18, %v622_v34  ;;  %v627_v38 = vsub.f32 %v603_v22, %v622_v34 }
 0x24d   : > { %v628_v39 = vmul.f32 1.442695, %v624_v35  ;;  %v630_v40 = vmul.f32 1.442695, %v625_v36  ;;  %v632_v41 = vmul.f32 1.442695, %v626_v37 }
 0x24e   : > { %v634_v42 = vmul.f32 1.442695, %v627_v38 }
 0x24f   : > { %960 = vpow2.f32 %v628_v39 }
 0x250   : > { %962 = vpow2.f32 %v630_v40 }
 0x251   : > { %964 = vpow2.f32 %v632_v41 }
 0x252   : > { %966 = vpow2.f32 %v634_v42 }
 0x253   : > { %968 = vpow2.f32 %v615_v50 }
 0x259   : > { %v961_v43 = vpop.eup %960 }
 0x25a   : > { %v963_v44 = vpop.eup %962 }
 0x25b   : > { %v636_v45 = vadd.f32 %v963_v44, %v961_v43  ;;  %v965_v46 = vpop.eup %964 }
 0x25c   : > { %v967_v48 = vpop.eup %966 }
 0x25d   : > { %v637_v47 = vadd.f32 %v965_v46, %v636_v45  ;;  %v969_v51 = vpop.eup %968 }
 0x25e   : > { %v618_v53 = vmul.f32 %v969_v51, %v617_v52 }
 0x25f   : > { %v638_v49 = vadd.f32 %v967_v48, %v637_v47 }
 0x261   : > { %639 = vadd.xlane.f32.xlu1 %v638_v49 }
 0x2eb   : > { %657 = sbr.rel (%p846_p13) target bundleno = 913 (0x391), region = 63 }
 0x2ee   : > { %v640_v54 = vpop.xlane.xlu1 %639 }
 0x2ef   : > { %v641_v55 = vadd.f32 %v640_v54, %v618_v53 }
 0x2f1   : > { %643 = vst.msk [vmem:[#allocation3] sm:$0xff] %vm642_vm1, %v641_v55 }
 0x2f8   : > { %v659_v56 = vld [vmem:[#allocation3] sm:$0xff] }
 0x2f9   : > { %971 = vlog2.f32 %v659_v56 }
 0x303   : > { %v972_v58 = vpop.eup %971 }
 0x304   : > { %v661_v60 = vmul.f32 0.6931472, %v972_v58 }
 0x306   : > { %v662_v61 = vadd.f32 %v661_v60, %v658_v59 }
 0x308   : > { %677 = vperm.xlu0 %970, %v662_v61  }
 0x387   : > { %v678_v10 = vpop.permute.xlu0 %677 }
 0x388   : > { %v680_v11 = vsub.f32 %v663_v62, %v678_v10  ;;  %v681_v12 = vsub.f32 %v664_v63, %v678_v10  ;;  %v682_v13 = vsub.f32 %v665_v0, %v678_v10  ;;  %v683_v14 = vsub.f32 %v666_v1, %v678_v10 }
 0x389   : > { %v684_v15 = vsub.f32 %v667_v2, %v678_v10  ;;  %v685_v16 = vsub.f32 %v668_v3, %v678_v10  ;;  %v686_v17 = vsub.f32 %v669_v4, %v678_v10  ;;  %v687_v18 = vsub.f32 %v670_v5, %v678_v10 }
 0x38a   : > { %v688_v19 = vsub.f32 %v671_v6, %v678_v10  ;;  %v689_v20 = vsub.f32 %v672_v7, %v678_v10  ;;  %v690_v21 = vsub.f32 %v673_v8, %v678_v10  ;;  %v691_v22 = vsub.f32 %v674_v9, %v678_v10  ;;  %692 = vst [vmem:[%s1198_s26] sm:$0xff] %v680_v11 }
 0x38b   : > { %693 = vst [vmem:[%s1198_s26 + $0x8] sm:$0xff] %v681_v12  ;;  %694 = vst [vmem:[%s1198_s26 + $0x10] sm:$0xff] %v682_v13 }
 0x38c   : > { %695 = vst [vmem:[%s1198_s26 + $0x18] sm:$0xff] %v683_v14  ;;  %696 = vst [vmem:[%s1198_s26 + $0x20] sm:$0xff] %v684_v15 }
 0x38d   : > { %697 = vst [vmem:[%s1198_s26 + $0x28] sm:$0xff] %v685_v16  ;;  %698 = vst [vmem:[%s1198_s26 + $0x30] sm:$0xff] %v686_v17 }
 0x38e   : > { %699 = vst [vmem:[%s1198_s26 + $0x38] sm:$0xff] %v687_v18  ;;  %700 = vst [vmem:[%s1198_s26 + $0x40] sm:$0xff] %v688_v19 }
 0x38f   : > { %701 = vst [vmem:[%s1198_s26 + $0x48] sm:$0xff] %v689_v20  ;;  %702 = vst [vmem:[%s1198_s26 + $0x50] sm:$0xff] %v690_v21 }
 0x390   : > { %703 = vst [vmem:[%s1198_s26 + $0x58] sm:$0xff] %v691_v22 }
 0x391 PF: > { %s13_s18 = sadd.s32 1, %s1027_s18   ;;  %s1295_s12 = smov %s1007_s13 }
 0x392   : > { %p10_p0 = scmp.ge.s32.totalorder %s13_s18, 8   ;;  %s1296_s13 = smov %s1102_s23 }
 0x393   : > { %s1297_s14 = smov %s1019_s16  ;;  %s1298_s15 = smov %s1023_s17 }
 0x394   : > { %s1299_s16 = smov %s1302_s19  ;;  %s1300_s17 = smov %s1306_s20 }
 0x395   :  { %12 = sbr.rel (!%p10_p0) target bundleno = 4 (0x4), region = 105 }

</bundles_post_ra>
